<compile_context>
chip_gen: v7x
topology: tpu7x:2x2x1
jax: 0.10.0
libtpu: 0.0.40
codegen_flags: <defaults>
</compile_context>

<pallas_src>
import jax
import jax.numpy as jnp
from jax.experimental import pallas as pl
from jax.experimental.pallas import tpu as pltpu


# ----------------------------------------------------------------------------
# Kernel
# ----------------------------------------------------------------------------
def _rope_kernel(t_ref, cos_ref, sin_ref, o_ref):
    # t block: (Bb, TS, D); table blocks: (TS, D) (broadcast over batch).
    t = t_ref[...]
    D = t.shape[-1]
    # roll(+ (D-1)) brings t[..., 2k+1] onto even lane 2k;
    # roll(+1)      brings t[..., 2k]   onto odd  lane 2k+1.
    t_up = pltpu.roll(t, D - 1, 2)        # t_up[..., i] = t[..., (i + 1) % D]
    t_dn = pltpu.roll(t, 1, 2)            # t_dn[..., i] = t[..., (i - 1) % D]
    lane = jax.lax.broadcasted_iota(jnp.int32, (1, D), 1)
    swapped = jnp.where((lane & 1) == 0, t_up, t_dn)       # pairwise swap of t
    out = t * cos_ref[...] + swapped * sin_ref[...]
    o_ref[...] = out.astype(o_ref.dtype)


# ----------------------------------------------------------------------------
# Table construction (module __init__ equivalent)
# ----------------------------------------------------------------------------
def make_rope_buffers(dim, max_length=512):
    """sin/cos tables exactly as the PyTorch module __init__ ((max_length, dim//2), f32)."""
    inv_freq = 1.0 / (10000.0 ** (jnp.arange(0, dim, 2, dtype=jnp.float32) / dim))
    pos = jnp.arange(max_length, dtype=jnp.float32)
    freqs = jnp.einsum("n,d->nd", pos, inv_freq)
    # TODO(synk): head_axis != None only adds a singleton broadcast axis to the
    # buffers; not needed for the (B, S, D) layout exercised here.
    return jnp.sin(freqs), jnp.cos(freqs)


def expand_rope_buffers(sin, cos, dtype=jnp.float32):
    """Pre-expand ONCE at init to lane-width-D duplicated/signed tables.

    cos_d: duplicated cos; sin_m: -sin on even lanes, +sin on odd lanes.
    Keep f32 for accuracy; the kernel upcasts/downcasts in-register.
    """
    n, dh = sin.shape
    cos_d = jnp.stack([cos, cos], axis=-1).reshape(n, 2 * dh)
    sin_m = jnp.stack([-sin, sin], axis=-1).reshape(n, 2 * dh)
    return cos_d.astype(dtype), sin_m.astype(dtype)


# ----------------------------------------------------------------------------
# Tiling helpers
# ----------------------------------------------------------------------------
def _tpu_generation_defaults():
    """Per-generation block byte target / VMEM cap / minimum grid size."""
    try:
        kind = jax.devices()[0].device_kind.lower()
    except Exception:  # pragma: no cover - defensive
        kind = ""
    if "v7" in kind:                       # 64 MiB VMEM / 2 TCs: stay lean, keep >=8 steps
        return {"target_bytes": 2 << 20, "vmem_cap": 40 << 20, "min_grid": 8}
    if any(v in kind for v in ("v4", "v5", "v6")):   # 128 MiB VMEM: bigger tiles
        return {"target_bytes": 4 << 20, "vmem_cap": 96 << 20, "min_grid": 4}
    return {"target_bytes": 2 << 20, "vmem_cap": 40 << 20, "min_grid": 8}


def _choose_tiles(B, S, D, itemsize, *, target_bytes, min_grid):
    """Pick (seq tile TS, batch block Bb): TS | S, sublane-aligned, block <= target."""
    align = max(8, 32 // max(1, itemsize))      # 8 f32, 16 bf16, 32 int8/fp8
    if S % align == 0:
        row_bytes = D * itemsize
        max_rows = max(align, (target_bytes // max(1, row_bytes)) // align * align)
        ts = min(S, max_rows)
        while S % ts != 0:
            ts -= align
        # Keep enough grid steps for pipelining / megacore load balance.
        while ts > align and (S // ts) * B < min_grid:
            nxt = ts - align
            while nxt > align and S % nxt != 0:
                nxt -= align
            if nxt < align or S % nxt != 0:
                break
            ts = nxt
    else:
        ts = S                                   # full-extent seq block is always legal
    num_s = S // ts

    bb = 1
    blk_bytes = ts * D * itemsize
    max_bb = max(1, target_bytes // max(1, blk_bytes))
    for cand in range(min(B, max_bb), 1, -1):
        if B % cand == 0 and num_s * (B // cand) >= min_grid:
            bb = cand
            break
    return ts, bb


# ----------------------------------------------------------------------------
# Forward pass (module.forward equivalent)
# ----------------------------------------------------------------------------
def rotary_position_embedding(t, cos_d, sin_m, offset=0):
    """RotaryPositionEmbedding.forward(t, offset) for t of shape (B, S, D).

    `cos_d` / `sin_m` are the pre-expanded (max_length, D) tables from
    `expand_rope_buffers`.  Output aliases input 0; donate `t` under jit
    (donate_argnums) to avoid a defensive copy.  D should ideally be a
    multiple of 128 for lane-dense stores (heads collapsed into D).
    """
    B, S, D = t.shape
    if D % 2 != 0:
        raise ValueError(f"feature dim must be even, got D={D}")
    if cos_d.shape != sin_m.shape or cos_d.shape[-1] != D:
        raise ValueError("expanded rope tables do not match feature dim")
    max_len = cos_d.shape[0]

    static_offset = isinstance(offset, int)
    if static_offset and (offset < 0 or offset + S > max_len):
        raise ValueError(f"offset+seqlen ({offset}+{S}) exceeds max_length {max_len}")
    # TODO(synk): traced offsets bypass this bounds check (dynamic_slice clamps);
    # a scalar-prefetch + in-kernel guard would be needed to trap them on-device.

    params = _tpu_generation_defaults()
    itemsize = jnp.dtype(t.dtype).itemsize
    TS, Bb = _choose_tiles(B, S, D, itemsize,
                           target_bytes=params["target_bytes"],
                           min_grid=params["min_grid"])
    grid = (S // TS, B // Bb)                    # batch innermost: tables stay resident

    # Fast path: static, tile-aligned offset is folded into the table index_map;
    # the full (max_len, D) tables are passed straight through (zero wrapper ops).
    if static_offset and TS % 8 == 0 and offset % TS == 0:
        off_blk = offset // TS
        cos_in, sin_in = cos_d, sin_m
        tab_index_map = lambda s, b: (s + off_blk, 0)
    else:
        # Fallback (unaligned or traced offset): one slice, no cast (tables pre-cast).
        cos_in = jax.lax.dynamic_slice_in_dim(cos_d, offset, S, axis=0)
        sin_in = jax.lax.dynamic_slice_in_dim(sin_m, offset, S, axis=0)
        tab_index_map = lambda s, b: (s, 0)

    tab_itemsize = jnp.dtype(cos_d.dtype).itemsize
    t_block = Bb * TS * D * itemsize
    tab_block = TS * D * tab_itemsize
    # in+out t double-buffered + 2 tables double-buffered + headroom, clamped per gen.
    needed = 4 * t_block + 4 * tab_block + (2 << 20)
    vmem_limit = int(min(max(needed, 16 << 20), params["vmem_cap"]))

    return pl.pallas_call(
        _rope_kernel,
        out_shape=jax.ShapeDtypeStruct((B, S, D), t.dtype),
        grid=grid,
        in_specs=[
            pl.BlockSpec((Bb, TS, D), lambda s, b: (b, s, 0)),   # t
            pl.BlockSpec((TS, D), tab_index_map),                # cos_d
            pl.BlockSpec((TS, D), tab_index_map),                # sin_m
        ],
        out_specs=pl.BlockSpec((Bb, TS, D), lambda s, b: (b, s, 0)),
        input_output_aliases={0: 0},   # RoPE is naturally in-place (donate t under jit)
        compiler_params=pltpu.CompilerParams(
            dimension_semantics=("parallel", "parallel"),
            vmem_limit_bytes=vmem_limit,
        ),
    )(t, cos_in, sin_in)


# ----------------------------------------------------------------------------
# Pure-JAX reference (mirrors the PyTorch forward exactly)
# ----------------------------------------------------------------------------
def _reference(t, sin_full, cos_full, offset=0):
    S = t.shape[1]
    sin = sin_full[offset:offset + S, :]
    cos = cos_full[offset:offset + S, :]
    t1 = t[..., 0::2]
    t2 = t[..., 1::2]
    out = jnp.stack([t1 * cos - t2 * sin, t1 * sin + t2 * cos], axis=-1)
    return out.reshape(*out.shape[:-2], -1)


if __name__ == "__main__":
    B, S, D = 2, 8, 128
    max_length = 512

    key = jax.random.PRNGKey(0)
    t = jax.random.normal(key, (B, S, D), dtype=jnp.float32)

    sin_full, cos_full = make_rope_buffers(D, max_length=max_length)
    cos_d, sin_m = expand_rope_buffers(sin_full, cos_full, dtype=jnp.float32)

    # offset=0 and 16 exercise the zero-copy aligned path; offset=3 the fallback.
    for offset in (0, 16, 3):
        out = rotary_position_embedding(t, cos_d, sin_m, offset=offset)
        out = jax.block_until_ready(out)
        ref = _reference(t, sin_full, cos_full, offset=offset)
        assert out.shape == ref.shape == (B, S, D)
        err = float(jnp.max(jnp.abs(out - ref)))
        assert jnp.allclose(out, ref, atol=1e-6, rtol=1e-6), (offset, err)

    print("KERNEL_OK")
</pallas_src>

<mosaic_0001>
module attributes {stable_mosaic.version = 11 : i64} {
  func.func @_rope_kernel(%arg0: i32, %arg1: i32, %arg2: memref<1x8x128xf32, #tpu.memory_space<vmem>>, %arg3: memref<8x128xf32, #tpu.memory_space<vmem>>, %arg4: memref<8x128xf32, #tpu.memory_space<vmem>>, %arg5: memref<1x8x128xf32, #tpu.memory_space<vmem>>) attributes {dimension_semantics = [#tpu.dimension_semantics<parallel>, #tpu.dimension_semantics<parallel>], iteration_bounds = array<i64: 1, 2>, scalar_prefetch = 0 : i64, scratch_operands = 0 : i64, tpu.core_type = #tpu.core_type<tc>, window_params = [{transform_indices = @transform_0, window_bounds = array<i64: 1, 8, 128>}, {transform_indices = @transform_1, window_bounds = array<i64: 8, 128>}, {transform_indices = @transform_2, window_bounds = array<i64: 8, 128>}, {transform_indices = @transform_3, window_bounds = array<i64: 1, 8, 128>}]} {
    %c0 = arith.constant 0 : index
    %c0_0 = arith.constant 0 : index
    %c0_1 = arith.constant 0 : index
    %0 = vector.load %arg2[%c0, %c0_0, %c0_1] : memref<1x8x128xf32, #tpu.memory_space<vmem>>, vector<1x8x128xf32>
    %c127_i32 = arith.constant 127 : i32
    %1 = tpu.dynamic_rotate %0 by %c127_i32 dim 2 : vector<1x8x128xf32>, i32 -> vector<1x8x128xf32>
    %c1_i32 = arith.constant 1 : i32
    %2 = tpu.dynamic_rotate %0 by %c1_i32 dim 2 : vector<1x8x128xf32>, i32 -> vector<1x8x128xf32>
    %3 = tpu.iota {dimensions = array<i32: 1>} : vector<1x128xi32>
    %c1_i32_2 = arith.constant 1 : i32
    %4 = vector.broadcast %c1_i32_2 : i32 to vector<1x128xi32>
    %5 = arith.andi %3, %4 : vector<1x128xi32>
    %c0_i32 = arith.constant 0 : i32
    %6 = vector.broadcast %c0_i32 : i32 to vector<1x128xi32>
    %7 = arith.cmpi eq, %5, %6 : vector<1x128xi32>
    %8 = vector.shape_cast %7 : vector<1x128xi1> to vector<1x1x128xi1>
    %9 = vector.broadcast %8 : vector<1x1x128xi1> to vector<1x8x128xi1>
    %10 = arith.select %9, %1, %2 : vector<1x8x128xi1>, vector<1x8x128xf32>
    %c0_3 = arith.constant 0 : index
    %c0_4 = arith.constant 0 : index
    %11 = vector.load %arg3[%c0_3, %c0_4] : memref<8x128xf32, #tpu.memory_space<vmem>>, vector<8x128xf32>
    %12 = vector.shape_cast %11 : vector<8x128xf32> to vector<1x8x128xf32>
    %13 = arith.mulf %0, %12 : vector<1x8x128xf32>
    %c0_5 = arith.constant 0 : index
    %c0_6 = arith.constant 0 : index
    %14 = vector.load %arg4[%c0_5, %c0_6] : memref<8x128xf32, #tpu.memory_space<vmem>>, vector<8x128xf32>
    %15 = vector.shape_cast %14 : vector<8x128xf32> to vector<1x8x128xf32>
    %16 = arith.mulf %10, %15 : vector<1x8x128xf32>
    %17 = arith.addf %13, %16 : vector<1x8x128xf32>
    %c0_7 = arith.constant 0 : index
    %c0_8 = arith.constant 0 : index
    %c0_9 = arith.constant 0 : index
    %18 = vector.load %arg5[%c0_7, %c0_8, %c0_9] : memref<1x8x128xf32, #tpu.memory_space<vmem>>, vector<1x8x128xf32>
    tpu.vector_store %arg5[%c0_7, %c0_8, %c0_9], %17 {strides = array<i32>} : memref<1x8x128xf32, #tpu.memory_space<vmem>>, vector<1x8x128xf32>,
    return
  }
  func.func @transform_0(%arg0: i32, %arg1: i32) -> (i32, i32, i32) {
    %c0_i32 = arith.constant 0 : i32
    %c0_i32_0 = arith.constant 0 : i32
    return %arg1, %arg0, %c0_i32 : i32, i32, i32
  }
  func.func @transform_1(%arg0: i32, %arg1: i32) -> (i32, i32) {
    %c0_i32 = arith.constant 0 : i32
    %0 = arith.addi %arg0, %c0_i32 : i32
    %c0_i32_0 = arith.constant 0 : i32
    %c0_i32_1 = arith.constant 0 : i32
    return %0, %c0_i32_0 : i32, i32
  }
  func.func @transform_2(%arg0: i32, %arg1: i32) -> (i32, i32) {
    %c0_i32 = arith.constant 0 : i32
    %0 = arith.addi %arg0, %c0_i32 : i32
    %c0_i32_0 = arith.constant 0 : i32
    %c0_i32_1 = arith.constant 0 : i32
    return %0, %c0_i32_0 : i32, i32
  }
  func.func @transform_3(%arg0: i32, %arg1: i32) -> (i32, i32, i32) {
    %c0_i32 = arith.constant 0 : i32
    %c0_i32_0 = arith.constant 0 : i32
    return %arg1, %arg0, %c0_i32 : i32, i32, i32
  }
}

</mosaic_0001>

<bundles_post_ra>
// kernel: tpu_custom_call.1
= control target key start
LH: loop header
LB: loop body
LE: loop exit
PB: predicated region body
PF: predicated region fallthrough
CT: control target
= control target key end

     0   :  { %8 = vsyncpa [#allocation3], 0  ;;  %s929_s0 = inlined_call_operand.hbm [shape: f32[2,8,128], index: 0, kind: input, shape index: {}, may-alias: {0,3}]   ;;  %s930_s1 = inlined_call_operand.hbm [shape: f32[512,128], index: 1, kind: input, shape index: {}]   ;;  %s931_s2 = inlined_call_operand.hbm [shape: f32[512,128], index: 2, kind: input, shape index: {}]   ;;  %s932_s3 = inlined_call_operand.hbm [shape: f32[2,8,128], index: 3, kind: output, shape index: {}, may-alias: {0,3}]  }
   0x1   :  { %10 = vsyncpa [#allocation3 + $0x1], 0 }
   0x2   :  { %11 = vsyncpa [#allocation6], 0 }
   0x3   :  { %12 = vsyncpa [#allocation4], 0 }
   0x4   :  { %14 = vsyncpa [#allocation4 + $0x1], 0  ;;  %s680_s12 = smov 0   ;;  %s682_s13 = smov 0  }
   0x5   :  { %s684_s14 = smov 0   ;;  %s686_s15 = smov 0  }
   0x6   :  { %s688_s16 = smov 0   ;;  %s690_s17 = smov 0  }
   0x7 LB: > { %s378_s18 = sadd.s32 4294967295, %s652_s17   ;;  %s379_s19 = sadd.s32 4294967294, %s652_s17   ;;  %s652_s17 = sphi %s690_s17, %s20_s17   ;;  %s648_s16 = sphi %s688_s16, %s955_s16   ;;  %s644_s15 = sphi %s686_s15, %s954_s15   ;;  %s640_s14 = sphi %s684_s14, %s953_s14   ;;  %s636_s13 = sphi %s682_s13, %s952_s13   ;;  %s632_s12 = sphi %s680_s12, %s951_s12  }
   0x8   : > { %p54_p0 = scmp.ne.s32.totalorder %s636_s13, %s632_s12  ;;  %p714_p1 = scmp.eq.s32.totalorder %s378_s18, 0 }
   0x9   : > { %p718_p2 = scmp.eq.s32.totalorder %s378_s18, 1  ;;  %p138_p3 = scmp.eq.s32.totalorder %s379_s19, 1 }
   0xa   : > { %s937_s20 = scalar_select %p714_p1, 1, 0 }
   0xb   : > { %s938_s21 = scalar_select %p718_p2, 1, 0 }
   0xc   : > { %p724_p4 = por %p714_p1, %p54_p0  ;;  %p380_p5 = scmp.ge.s32.totalorder %s652_s17, 1 }
   0xd   : > { %p729_p6 = por %p138_p3, %p54_p0  ;;  %p145_p7 = scmp.lt.s32.totalorder %s652_s17, 3 }
   0xe   : > { %s939_s22 = scalar_select %p724_p4, 1, 0 }
   0xf   : > { %s940_s23 = scalar_select %p729_p6, 1, 0 }
  0x10   : > { %p734_p8 = pnand %p380_p5, %p145_p7  ;;  %s654_s25 = smov [#allocation5]  }
  0x11   : > { %s160_s26 = sshll.u32 %s654_s25, 4  ;;  %s655_s27 = smov [#allocation7]   ;;  %s161_s26 = int_to_ptr.vmem [resolvable:$true] %s160_s26 }
  0x12   : > { %s941_s24 = scalar_select %p734_p8, 1, 0 }
  0x13   : > { %p407_p10 = pneg %p734_p8  ;;  %s173_s28 = sshll.u32 %s655_s27, 4  ;;  %s747_s28 = int_to_ptr.vmem [resolvable:$true] %s173_s28 }
  0x14   : > { %s480_s5 = scalar_lea.hbm %s930_s1, 128  ;;  %s485_s10 = scalar_lea.hbm %s930_s1, 8192 }
  0x15   : > { %p743_p11 = pnand %p407_p10, %p714_p1  ;;  %p481_p12 = scmp.ne.s32.totalorder %s930_s1, %s480_s5 }
  0x16   : > { %p486_p5 = scmp.lt.u32.totalorder %s485_s10, %s480_s5  ;;  %p487_p7 = scmp.lt.u32.totalorder %s480_s5, %s930_s1 }
  0x17   : > { %p482_p13 = pneg %p743_p11 }
  0x18   : > { %p488_p10 = por %p487_p7, %p486_p5 }
  0x19   : > { %p483_p0 = pnand %p482_p13, %p481_p12 }
  0x1b   : > { %p484_p3 = pneg %p483_p0 }
  0x1d   : > { %p489_p9 = pnand %p488_p10, %p484_p3 }
  0x1f   : > { %492 = shalt.err (!%p489_p9)
}
  0x20   : > { %s493_s19 = scalar_lea.vmem %s161_s26, 128  ;;  %p501_p0 = scmp.lt.s32.totalorder %s161_s26, %s161_s26 }
  0x21   : > { %p494_p6 = scmp.ne.s32.totalorder %s161_s26, %s493_s19  ;;  %p502_p4 = scmp.lt.s32.totalorder %s493_s19, %s493_s19 }
  0x23   : > { %p496_p1 = pnand %p494_p6, %p482_p13  ;;  %p503_p8 = por %p502_p4, %p501_p0 }
  0x25   : > { %p497_p12 = pneg %p496_p1 }
  0x27   : > { %p504_p2 = pnand %p503_p8, %p497_p12 }
  0x29   : > { %507 = shalt.err (!%p504_p2)
}
  0x2a   : > { %410 = dma.hbm_to_vmem [thread:$0]  (!%p743_p11), %s930_s1, 128, %s161_s26, [#allocation6]  }
  0x2b   : > { %s508_s5 = scalar_lea.hbm %s931_s2, 128  ;;  %s513_s10 = scalar_lea.hbm %s931_s2, 8192 }
  0x2c   : > { %p509_p1 = scmp.ne.s32.totalorder %s931_s2, %s508_s5  ;;  %p514_p2 = scmp.lt.u32.totalorder %s513_s10, %s508_s5 }
  0x2d   : > { %p515_p8 = scmp.lt.u32.totalorder %s508_s5, %s931_s2 }
  0x2e   : > { %p511_p4 = pnand %p509_p1, %p482_p13 }
  0x2f   : > { %p516_p9 = por %p515_p8, %p514_p2 }
  0x30   : > { %p512_p6 = pneg %p511_p4 }
  0x32   : > { %p517_p3 = pnand %p516_p9, %p512_p6 }
  0x34   : > { %520 = shalt.err (!%p517_p3)
}
  0x35   : > { %s521_s26 = scalar_lea.vmem %s747_s28, 128  ;;  %p529_p12 = scmp.lt.s32.totalorder %s747_s28, %s747_s28 }
  0x36   : > { %p522_p5 = scmp.ne.s32.totalorder %s747_s28, %s521_s26  ;;  %p530_p0 = scmp.lt.s32.totalorder %s521_s26, %s521_s26 }
  0x38   : > { %p524_p7 = pnand %p522_p5, %p482_p13  ;;  %p531_p1 = por %p530_p0, %p529_p12 }
  0x3a   : > { %p525_p10 = pneg %p524_p7 }
  0x3c   : > { %p532_p4 = pnand %p531_p1, %p525_p10 }
  0x3e   : > { %535 = shalt.err (!%p532_p4)
}
  0x3f   : > { %413 = dma.hbm_to_vmem [thread:$0]  (!%p743_p11), %s931_s2, 128, %s747_s28, [#allocation6]  }
  0x40   : > { %s29_s27 = sadd.s32 1, %s648_s16  ;;  %s41_s30 = sadd.s32 1, %s640_s14 }
  0x41   : > { %p30_p13 = scmp.ge.s32.totalorder %s29_s27, 2  ;;  %p48_p6 = scmp.ne.s32.totalorder %s640_s14, %s636_s13 }
  0x42   : > { %p49_p2 = scmp.eq.s32.totalorder %s652_s17, 0  ;;  %p424_p8 = scmp.lt.s32.totalorder %s652_s17, 2 }
  0x43   : > { %s957_s27 = smov (%p30_p13, %s29_s27), 0  ;;  %p943_p3 = scmp.ne.s32.totalorder %s938_s21, 0 }
  0x44   : > { %p50_p9 = por %p49_p2, %p48_p6  ;;  %s36_s4 = ssub.s32 %s648_s16, %s957_s27 }
  0x45   : > { %p812_p5 = por %p943_p3, %p48_p6  ;;  %s184_s5 = sand.u32 1, %s640_s14  }
  0x46   : > { %p39_p7 = scmp.eq.s32.totalorder %s36_s4, 0  ;;  %s384_s28 = sshll.u32 %s184_s5, 3 }
  0x47   : > { %s385_s6 = sshll.u32 %s648_s16, 7  ;;  %s188_s21 = scalar_lea.vmem [#allocation2], %s384_s28 }
  0x48   : > { %s821_s7 = scalar_select %p39_p7, %s640_s14, %s41_s30  }
  0x49   : > { %s826_s10 = scalar_lea.hbm %s929_s0, %s385_s6  ;;  %s196_s11 = sshll.u32 %s188_s21, 4  ;;  %s834_s11 = int_to_ptr.vmem [resolvable:$true] %s196_s11 }
  0x4a   : > { %p830_p11 = pnand %p424_p8, %p50_p9  ;;  %s185_s26 = scalar_lea.sflag [#allocation3], %s184_s5 }
  0x4b   : > { %s536_s19 = scalar_lea.hbm %s826_s10, 128  ;;  %s541_s4 = scalar_lea.hbm %s929_s0, 256 }
  0x4c   : > { %p537_p10 = scmp.ne.s32.totalorder %s826_s10, %s536_s19  ;;  %p538_p12 = pneg %p830_p11 }
  0x4d   : > { %p542_p4 = scmp.lt.u32.totalorder %s826_s10, %s929_s0  ;;  %p543_p13 = scmp.lt.u32.totalorder %s541_s4, %s536_s19 }
  0x4e   : > { %p539_p0 = pnand %p538_p12, %p537_p10  ;;  %p545_p2 = scmp.lt.u32.totalorder %s536_s19, %s826_s10 }
  0x4f   : > { %p544_p6 = por %p543_p13, %p542_p4 }
  0x50   : > { %p540_p1 = pneg %p539_p0 }
  0x51   : > { %p546_p8 = por %p545_p2, %p544_p6 }
  0x53   : > { %p547_p9 = pnand %p546_p8, %p540_p1 }
  0x55   : > { %550 = shalt.err (!%p547_p9)
}
  0x56   : > { %s551_s5 = scalar_lea.vmem %s834_s11, 128  ;;  %s656_s8 = smov [#allocation2]  }
  0x57   : > { %p552_p3 = scmp.ne.s32.totalorder %s834_s11, %s551_s5  ;;  %s556_s9 = sshll.u32 %s656_s8, 4  ;;  %s557_s9 = int_to_ptr.vmem [resolvable:$false] %s556_s9 }
  0x58   : > { %s558_s21 = scalar_lea.vmem %s557_s9, 256  ;;  %p559_p0 = scmp.lt.s32.totalorder %s834_s11, %s557_s9 }
  0x59   : > { %p554_p7 = pnand %p552_p3, %p538_p12  ;;  %p560_p4 = scmp.lt.s32.totalorder %s558_s21, %s551_s5 }
  0x5b   : > { %p555_p10 = pneg %p554_p7  ;;  %p561_p13 = por %p560_p4, %p559_p0 }
  0x5d   : > { %p562_p6 = pnand %p561_p13, %p555_p10 }
  0x5f   : > { %565 = shalt.err (!%p562_p6)
}
  0x60   : > { %417 = dma.hbm_to_vmem [thread:$0]  (!%p830_p11), %s826_s10, 128, %s834_s11, %s185_s26  }
  0x61   : > { %p946_p1 = scmp.ne.s32.totalorder %s941_s24, 0 }
  0x62   : > { %s864_s19 = sand.u32 (!%p946_p1), 1, %s636_s13   ;;  %p947_p12 = scmp.ne.s32.totalorder (!%p946_p1), %s939_s22, 0 }
  0x63   : > { %205 = sbr.rel (%p946_p1) target bundleno = 249 (0xf9), region = 32  ;;  %s387_s25 = sshll.u32 (!%p946_p1), %s864_s19, 3 }
  0x64   : > { %s208_s30 = scalar_lea.sflag (!%p946_p1), [#allocation3], %s864_s19  ;;  %s211_s4 = scalar_lea.vmem (!%p946_p1), [#allocation2], %s387_s25 }
  0x6a   : > { %619 = dma.done.wait (%p947_p12), %s208_s30, 128  }
  0x6b   : > { %621 = vsyncadd (%p947_p12), %s208_s30, 4294967168  ;;  %p948_p2 = scmp.ne.s32.totalorder %s937_s20, 0 }
  0x6d   : > { %623 = dma.done.wait (%p948_p2), [#allocation6], 256  }
  0x6e   : > { %625 = vsyncadd (%p948_p2), [#allocation6], 4294967040  ;;  %v242_v0 = vld [vmem:[%s211_s4] sm:$0xff]  ;;  %s657_s24 = smov 127   ;;  %s658_s10 = smov 1   ;;  %v247_v1 = vlaneseq  ;;  %v254_v5 = vld [vmem:[#allocation5] sm:$0xff] }
  0x6f   : > { %243 = vrot.lane.b32.xlu0 %v242_v0, %s657_s24  ;;  %v256_v6 = vld [vmem:[#allocation7] sm:$0xff]  ;;  %v255_v7 = vmul.f32 %v254_v5, %v242_v0  ;;  %s392_s20 = sshll.u32 %s644_s15, 7  ;;  %s241_s22 = scalar_lea.vmem [#allocation8], %s387_s25 }
  0x70   : > { %v248_v2 = vand.u32 127, %v247_v1  ;;  %s275_s11 = sshll.u32 %s241_s22, 4  ;;  %s880_s28 = scalar_lea.hbm %s932_s3, %s392_s20  ;;  %s882_s11 = int_to_ptr.vmem [resolvable:$true] %s275_s11 }
  0x71   : > { %s261_s6 = scalar_lea.sflag [#allocation4], %s864_s19  ;;  %s566_s5 = scalar_lea.vmem %s882_s11, 128 }
  0x72   : > { %v249_v3 = vand.u32 1, %v248_v2  ;;  %p567_p11 = scmp.ne.s32.totalorder %s882_s11, %s566_s5  ;;  %s659_s15 = smov [#allocation8]  }
  0x73   : > { %245 = vrot.lane.b32.xlu0 %v242_v0, %s658_s10  ;;  %s570_s8 = sshll.u32 %s659_s15, 4  ;;  %s571_s8 = int_to_ptr.vmem [resolvable:$false] %s570_s8 }
  0x74   : > { %vm250_vm0 = vcmp.eq.s32.totalorder %v249_v3, 0  ;;  %p568_p8 = pnand %p567_p11, %p812_p5  ;;  %s572_s9 = scalar_lea.vmem %s571_s8, 256 }
  0x75   : > { %p573_p3 = scmp.lt.s32.totalorder %s882_s11, %s571_s8  ;;  %p574_p7 = scmp.lt.s32.totalorder %s572_s9, %s566_s5 }
  0x76   : > { %p569_p9 = pneg %p568_p8 }
  0x77   : > { %p575_p10 = por %p574_p7, %p573_p3 }
  0x79   : > { %p576_p0 = pnand %p575_p10, %p569_p9 }
  0xe1   : > { %v244_v4 = vpop.permute.xlu0 %243 }
  0xe5   : > { %v246_v8 = vpop.permute.xlu0 %245 }
  0xe6   : > { %v253_v9 = vsel %vm250_vm0, %v244_v4, %v246_v8 }
  0xe7   : > { %v257_v10 = vmul.f32 %v256_v6, %v253_v9 }
  0xe9   : > { %v258_v11 = vadd.f32 %v257_v10, %v255_v7 }
  0xeb   : > { %259 = vst [vmem:[%s241_s22] sm:$0xff] %v258_v11 }
  0xec   : > { %579 = shalt.err (!%p576_p0)
}
  0xed   : > { %s580_s21 = scalar_lea.hbm %s880_s28, 128  ;;  %s584_s30 = scalar_lea.hbm %s932_s3, 256 }
  0xee   : > { %p581_p4 = scmp.ne.s32.totalorder %s880_s28, %s580_s21  ;;  %p585_p1 = scmp.lt.u32.totalorder %s880_s28, %s932_s3 }
  0xef   : > { %p586_p12 = scmp.lt.u32.totalorder %s584_s30, %s580_s21  ;;  %p588_p11 = scmp.lt.u32.totalorder %s580_s21, %s880_s28 }
  0xf0   : > { %p582_p13 = pnand %p581_p4, %p812_p5 }
  0xf1   : > { %p587_p2 = por %p586_p12, %p585_p1 }
  0xf2   : > { %p583_p6 = pneg %p582_p13 }
  0xf3   : > { %p589_p8 = por %p588_p11, %p587_p2 }
  0xf5   : > { %p590_p9 = pnand %p589_p8, %p583_p6 }
  0xf7   : > { %593 = shalt.err (!%p590_p9)
}
  0xf8   : > { %405 = dma.vmem_to_hbm [thread:$0]  (%p812_p5), %s882_s11, 128, %s880_s28, %s261_s6  }
  0xf9 PF: > { %s287_s10 = sand.u32 1, %s632_s12   ;;  %p949_p3 = scmp.ne.s32.totalorder %s940_s23, 0 }
  0xfa   : > { %p950_p7 = scmp.ge.s32.totalorder %s652_s17, 2  ;;  %s288_s20 = scalar_lea.sflag [#allocation4], %s287_s10 }
  0xfc   : > { %p419_p10 = pnand %p950_p7, %p949_p3 }
  0xfe   : > { %627 = dma.done.wait (!%p419_p10), %s288_s20, 128  }
  0xff   : > { %629 = vsyncadd (!%p419_p10), %s288_s20, 4294967168  ;;  %s20_s17 = sadd.s32 1, %s652_s17   ;;  %s951_s12 = smov %s636_s13 }
 0x100   : > { %p17_p0 = scmp.ge.s32.totalorder %s20_s17, 4   ;;  %s952_s13 = smov %s640_s14 }
 0x101   : > { %s953_s14 = smov %s821_s7  ;;  %s954_s15 = smov %s648_s16 }
 0x102   : > { %s955_s16 = smov %s957_s27  ;;  %19 = sbr.rel (!%p17_p0) target bundleno = 7 (0x7), region = 87 }
 0x109   :  { %293 = vsyncpa [#allocation3], 1 }
 0x10a   :  { %295 = vsyncpa [#allocation3 + $0x1], 1 }
 0x10b   :  { %296 = vsyncpa [#allocation6], 1 }
 0x10c   :  { %297 = vsyncpa [#allocation4], 1 }
 0x10d   :  { %299 = vsyncpa [#allocation4 + $0x1], 1 }

</bundles_post_ra>
